<compile_context>
chip_gen: v7x
topology: tpu7x:2x2x1
jax: 0.10.0
libtpu: 0.0.40
codegen_flags: <defaults>
</compile_context>

<pallas_src>
import jax
import jax.numpy as jnp
from jax.experimental import pallas as pl
from jax.experimental.pallas import tpu as pltpu


# ----------------------------------------------------------------------------
# Fused kernel:
#   x_ref    : (1, H, W*Cin)        one batch element, NHWC lane-flattened
#   wb_ref   : (3, W*Cin, W*Cout)   banded conv weight (dx + W-pad folded in)
#   bias_ref : (1, W*Cout)          conv bias tiled along W
#   fcw_ref  : (W*Cout, K)          FC weight tiled along W, pre-scaled 1/(H*W)
#   fcb_ref  : (1, K)               FC bias
#   tmp_ref  : (1, H, W*Cout)       rst_tmp (lane-dense)
#   cls_ref  : (1, 1, K)            rst (classifier logits)
#   xpad_scr : (H+2, W*Cin)         VMEM scratch for the H halo
# ----------------------------------------------------------------------------
def conv_gap_fc_kernel(x_ref, wb_ref, bias_ref, fcw_ref, fcb_ref,
                       tmp_ref, cls_ref, xpad_scr):
    H = tmp_ref.shape[1]
    WCin = x_ref.shape[2]
    WCout = tmp_ref.shape[2]

    # In-kernel halo padding along H (rows 0 and H+1 are the zero border).
    zrow = jnp.zeros((1, WCin), jnp.float32)
    xpad_scr[pl.ds(0, 1), :] = zrow
    xpad_scr[pl.ds(H + 1, 1), :] = zrow
    xpad_scr[pl.ds(1, H), :] = x_ref[0]

    # 3 MXU pushes (one per dy): (H, W*Cin) @ (W*Cin, W*Cout), f32 accumulate
    # in a lane-dense (H, W*Cout) register tile.
    acc = jnp.zeros((H, WCout), jnp.float32)
    for dy in range(3):                      # static, unrolled at trace time
        acc = acc + jnp.dot(xpad_scr[pl.ds(dy, H), :], wb_ref[dy],
                            preferred_element_type=jnp.float32)

    relu = jnp.maximum(acc + bias_ref[...], 0.0)
    tmp_ref[0] = relu                        # full-lane (H, 128) store

    # Fused GAP + FC epilogue while the activation is still in vregs.
    # 1/(H*W) is pre-folded into fcw_ref, so a plain sum suffices.
    pooled = jnp.sum(relu, axis=0, keepdims=True)            # (1, W*Cout)
    cls_ref[0] = (jnp.dot(pooled, fcw_ref[...],
                          preferred_element_type=jnp.float32)
                  + fcb_ref[...])


# ----------------------------------------------------------------------------
# Wrapper-side (one-time) parameter transforms
# ----------------------------------------------------------------------------
def _banded_conv_weight(w_hwio, W):
    """(3, 3, Cin, Cout) -> (3, W*Cin, W*Cout) banded matrix.

    wb[dy, w_in*Cin+ci, w_out*Cout+co] = w[dy, w_in-w_out+1, ci, co]
    when 0 <= w_in-w_out+1 <= 2, else 0.  This folds the dx taps and the
    W-direction zero padding of the SAME conv into one matmul per dy.
    """
    Cin, Cout = w_hwio.shape[2], w_hwio.shape[3]
    w_in = jnp.arange(W)[:, None]                 # (W, 1)
    w_out = jnp.arange(W)[None, :]                # (1, W)
    dx = w_in - w_out + 1                         # (W, W)
    valid = (dx >= 0) & (dx <= 2)
    dx_c = jnp.clip(dx, 0, 2)
    wb = w_hwio[:, dx_c, :, :]                    # (3, W, W, Cin, Cout)
    wb = jnp.where(valid[None, :, :, None, None], wb, 0.0)
    wb = jnp.transpose(wb, (0, 1, 3, 2, 4))       # (3, w_in, Cin, w_out, Cout)
    return wb.reshape(3, W * Cin, W * Cout)


# ----------------------------------------------------------------------------
# Concat_models forward: rst_tmp = model_1(x); rst = model_2(rst_tmp)
# ----------------------------------------------------------------------------
def concat_models_forward(x_nchw, params):
    N, Cin, H, W = x_nchw.shape
    Cout = params["conv_b"].shape[0]
    K = params["fc_b"].shape[0]

    # NCHW -> NHWC -> (N, H, W*Cin): contiguous, lane-flattened input.
    x_flat = jnp.transpose(x_nchw, (0, 2, 3, 1)).reshape(N, H, W * Cin)

    wb = _banded_conv_weight(params["conv_w"], W)                 # (3,W*Cin,W*Cout)
    bias_t = jnp.tile(params["conv_b"], W).reshape(1, W * Cout)   # (1, W*Cout)
    fcw = jnp.tile(params["fc_w"], (W, 1)) * (1.0 / (H * W))      # (W*Cout, K)
    fcb = params["fc_b"].reshape(1, K)

    tmp_flat, rst3 = pl.pallas_call(
        conv_gap_fc_kernel,
        out_shape=(
            jax.ShapeDtypeStruct((N, H, W * Cout), jnp.float32),
            jax.ShapeDtypeStruct((N, 1, K), jnp.float32),
        ),
        grid=(N,),
        in_specs=[
            pl.BlockSpec((1, H, W * Cin), lambda n: (n, 0, 0)),
            pl.BlockSpec((3, W * Cin, W * Cout), lambda n: (0, 0, 0)),
            pl.BlockSpec((1, W * Cout), lambda n: (0, 0)),
            pl.BlockSpec((W * Cout, K), lambda n: (0, 0)),
            pl.BlockSpec((1, K), lambda n: (0, 0)),
        ],
        out_specs=(
            pl.BlockSpec((1, H, W * Cout), lambda n: (n, 0, 0)),
            pl.BlockSpec((1, 1, K), lambda n: (n, 0, 0)),
        ),
        scratch_shapes=[pltpu.VMEM((H + 2, W * Cin), jnp.float32)],
        compiler_params=pltpu.CompilerParams(
            dimension_semantics=("parallel",)),
    )(x_flat, wb, bias_t, fcw, fcb)

    # rst_tmp back to PyTorch NCHW convention (free contiguous reshape + T).
    rst_tmp = jnp.transpose(tmp_flat.reshape(N, H, W, Cout), (0, 3, 1, 2))
    rst = rst3.reshape(N, K)
    return rst_tmp, rst


def init_params(key, cin, cout, num_classes):
    k1, k2, k3, k4 = jax.random.split(key, 4)
    # PyTorch conv weight layout (Cout, Cin, 3, 3) -> HWIO (3, 3, Cin, Cout)
    conv_w_oihw = jax.random.normal(k1, (cout, cin, 3, 3), jnp.float32) * 0.1
    conv_w = jnp.transpose(conv_w_oihw, (2, 3, 1, 0))
    conv_b = jax.random.normal(k2, (cout,), jnp.float32) * 0.1
    # PyTorch Linear weight (K, C) -> (C, K)
    fc_w_kc = jax.random.normal(k3, (num_classes, cout), jnp.float32) * 0.1
    fc_w = jnp.transpose(fc_w_kc, (1, 0))
    fc_b = jax.random.normal(k4, (num_classes,), jnp.float32) * 0.1
    return {"conv_w": conv_w, "conv_b": conv_b, "fc_w": fc_w, "fc_b": fc_b}


if __name__ == "__main__":
    N, Cin, H, W = 2, 4, 16, 16
    Cout, num_classes = 8, 10

    key = jax.random.PRNGKey(0)
    kx, kp = jax.random.split(key)
    x = jax.random.normal(kx, (N, Cin, H, W), jnp.float32)   # NCHW like PyTorch
    params = init_params(kp, Cin, Cout, num_classes)

    rst_tmp, rst = jax.jit(concat_models_forward)(x, params)
    jax.block_until_ready((rst_tmp, rst))

    # sanity check against pure-JAX reference
    ref_tmp = jax.lax.conv_general_dilated(
        x, jnp.transpose(params["conv_w"], (3, 2, 0, 1)),
        window_strides=(1, 1), padding="SAME",
        dimension_numbers=("NCHW", "OIHW", "NCHW"),
    ) + params["conv_b"][None, :, None, None]
    ref_tmp = jnp.maximum(ref_tmp, 0.0)
    ref_rst = jnp.mean(ref_tmp, axis=(2, 3)) @ params["fc_w"] + params["fc_b"]

    assert rst_tmp.shape == (N, Cout, H, W)
    assert rst.shape == (N, num_classes)
    assert jnp.allclose(rst_tmp, ref_tmp, atol=1e-4), "conv mismatch"
    assert jnp.allclose(rst, ref_rst, atol=1e-4), "head mismatch"
    print("KERNEL_OK")
</pallas_src>

<mosaic_0001>
module attributes {stable_mosaic.version = 11 : i64} {
  func.func @conv_gap_fc_kernel(%arg0: i32, %arg1: memref<1x16x64xf32, #tpu.memory_space<vmem>>, %arg2: memref<3x64x128xf32, #tpu.memory_space<vmem>>, %arg3: memref<1x128xf32, #tpu.memory_space<vmem>>, %arg4: memref<128x10xf32, #tpu.memory_space<vmem>>, %arg5: memref<1x10xf32, #tpu.memory_space<vmem>>, %arg6: memref<1x16x128xf32, #tpu.memory_space<vmem>>, %arg7: memref<1x1x10xf32, #tpu.memory_space<vmem>>, %arg8: memref<18x64xf32, #tpu.memory_space<vmem>>) attributes {dimension_semantics = [#tpu.dimension_semantics<parallel>], iteration_bounds = array<i64: 2>, scalar_prefetch = 0 : i64, scratch_operands = 1 : i64, tpu.core_type = #tpu.core_type<tc>, window_params = [{transform_indices = @transform_0, window_bounds = array<i64: 1, 16, 64>}, {pipeline_mode = #tpu.pipeline_mode<synchronous>, transform_indices = @transform_1, window_bounds = array<i64: 3, 64, 128>}, {pipeline_mode = #tpu.pipeline_mode<synchronous>, transform_indices = @transform_2, window_bounds = array<i64: 1, 128>}, {pipeline_mode = #tpu.pipeline_mode<synchronous>, transform_indices = @transform_3, window_bounds = array<i64: 128, 10>}, {pipeline_mode = #tpu.pipeline_mode<synchronous>, transform_indices = @transform_4, window_bounds = array<i64: 1, 10>}, {transform_indices = @transform_5, window_bounds = array<i64: 1, 16, 128>}, {transform_indices = @transform_6, window_bounds = array<i64: 1, 1, 10>}]} {
    %cst = arith.constant 0.000000e+00 : f32
    %0 = vector.broadcast %cst : f32 to vector<1x64xf32>
    %c0 = arith.constant 0 : index
    %c0_0 = arith.constant 0 : index
    %1 = vector.load %arg8[%c0, %c0_0] : memref<18x64xf32, #tpu.memory_space<vmem>>, vector<1x64xf32>
    tpu.vector_store %arg8[%c0, %c0_0], %0 {strides = array<i32>} : memref<18x64xf32, #tpu.memory_space<vmem>>, vector<1x64xf32>,
    %c17 = arith.constant 17 : index
    %c0_1 = arith.constant 0 : index
    %2 = vector.load %arg8[%c17, %c0_1] : memref<18x64xf32, #tpu.memory_space<vmem>>, vector<1x64xf32>
    tpu.vector_store %arg8[%c17, %c0_1], %0 {strides = array<i32>} : memref<18x64xf32, #tpu.memory_space<vmem>>, vector<1x64xf32>,
    %c0_2 = arith.constant 0 : index
    %c0_3 = arith.constant 0 : index
    %c0_4 = arith.constant 0 : index
    %3 = vector.load %arg1[%c0_2, %c0_3, %c0_4] : memref<1x16x64xf32, #tpu.memory_space<vmem>>, vector<1x16x64xf32>
    %4 = vector.shape_cast %3 : vector<1x16x64xf32> to vector<16x64xf32>
    %c1 = arith.constant 1 : index
    %c0_5 = arith.constant 0 : index
    %5 = vector.load %arg8[%c1, %c0_5] : memref<18x64xf32, #tpu.memory_space<vmem>>, vector<16x64xf32>
    tpu.vector_store %arg8[%c1, %c0_5], %4 {strides = array<i32>} : memref<18x64xf32, #tpu.memory_space<vmem>>, vector<16x64xf32>,
    %cst_6 = arith.constant 0.000000e+00 : f32
    %6 = vector.broadcast %cst_6 : f32 to vector<16x128xf32>
    %c0_7 = arith.constant 0 : index
    %c0_8 = arith.constant 0 : index
    %7 = vector.load %arg8[%c0_7, %c0_8] : memref<18x64xf32, #tpu.memory_space<vmem>>, vector<16x64xf32>
    %c0_9 = arith.constant 0 : index
    %c0_10 = arith.constant 0 : index
    %c0_11 = arith.constant 0 : index
    %8 = vector.load %arg2[%c0_9, %c0_10, %c0_11] : memref<3x64x128xf32, #tpu.memory_space<vmem>>, vector<1x64x128xf32>
    %9 = vector.shape_cast %8 : vector<1x64x128xf32> to vector<64x128xf32>
    %cst_12 = arith.constant dense<0.000000e+00> : vector<16x128xf32>
    %10 = tpu.matmul %7, %9, %cst_12 {dimension_numbers = #tpu.dot_dimension_numbers<[1], [0], [0], [1], [0, 0, 1, 1], [], []>} : vector<16x64xf32>, vector<64x128xf32>, vector<16x128xf32> -> vector<16x128xf32>
    %11 = arith.addf %6, %10 : vector<16x128xf32>
    %c1_13 = arith.constant 1 : index
    %c0_14 = arith.constant 0 : index
    %12 = vector.load %arg8[%c1_13, %c0_14] : memref<18x64xf32, #tpu.memory_space<vmem>>, vector<16x64xf32>
    %c1_15 = arith.constant 1 : index
    %c0_16 = arith.constant 0 : index
    %c0_17 = arith.constant 0 : index
    %13 = vector.load %arg2[%c1_15, %c0_16, %c0_17] : memref<3x64x128xf32, #tpu.memory_space<vmem>>, vector<1x64x128xf32>
    %14 = vector.shape_cast %13 : vector<1x64x128xf32> to vector<64x128xf32>
    %cst_18 = arith.constant dense<0.000000e+00> : vector<16x128xf32>
    %15 = tpu.matmul %12, %14, %cst_18 {dimension_numbers = #tpu.dot_dimension_numbers<[1], [0], [0], [1], [0, 0, 1, 1], [], []>} : vector<16x64xf32>, vector<64x128xf32>, vector<16x128xf32> -> vector<16x128xf32>
    %16 = arith.addf %11, %15 : vector<16x128xf32>
    %c2 = arith.constant 2 : index
    %c0_19 = arith.constant 0 : index
    %17 = vector.load %arg8[%c2, %c0_19] : memref<18x64xf32, #tpu.memory_space<vmem>>, vector<16x64xf32>
    %c2_20 = arith.constant 2 : index
    %c0_21 = arith.constant 0 : index
    %c0_22 = arith.constant 0 : index
    %18 = vector.load %arg2[%c2_20, %c0_21, %c0_22] : memref<3x64x128xf32, #tpu.memory_space<vmem>>, vector<1x64x128xf32>
    %19 = vector.shape_cast %18 : vector<1x64x128xf32> to vector<64x128xf32>
    %cst_23 = arith.constant dense<0.000000e+00> : vector<16x128xf32>
    %20 = tpu.matmul %17, %19, %cst_23 {dimension_numbers = #tpu.dot_dimension_numbers<[1], [0], [0], [1], [0, 0, 1, 1], [], []>} : vector<16x64xf32>, vector<64x128xf32>, vector<16x128xf32> -> vector<16x128xf32>
    %21 = arith.addf %16, %20 : vector<16x128xf32>
    %c0_24 = arith.constant 0 : index
    %c0_25 = arith.constant 0 : index
    %22 = vector.load %arg3[%c0_24, %c0_25] : memref<1x128xf32, #tpu.memory_space<vmem>>, vector<1x128xf32>
    %23 = vector.broadcast %22 : vector<1x128xf32> to vector<16x128xf32>
    %24 = arith.addf %21, %23 : vector<16x128xf32>
    %cst_26 = arith.constant 0.000000e+00 : f32
    %25 = vector.broadcast %cst_26 : f32 to vector<16x128xf32>
    %26 = arith.maximumf %24, %25 : vector<16x128xf32>
    %c0_27 = arith.constant 0 : index
    %c0_28 = arith.constant 0 : index
    %c0_29 = arith.constant 0 : index
    %27 = vector.load %arg6[%c0_27, %c0_28, %c0_29] : memref<1x16x128xf32, #tpu.memory_space<vmem>>, vector<1x16x128xf32>
    %28 = vector.shape_cast %27 : vector<1x16x128xf32> to vector<16x128xf32>
    %29 = vector.shape_cast %26 : vector<16x128xf32> to vector<1x16x128xf32>
    tpu.vector_store %arg6[%c0_27, %c0_28, %c0_29], %29 {strides = array<i32>} : memref<1x16x128xf32, #tpu.memory_space<vmem>>, vector<1x16x128xf32>,
    %cst_30 = arith.constant dense<0.000000e+00> : vector<128xf32>
    %30 = vector.multi_reduction <add>, %26, %cst_30 [0] : vector<16x128xf32> to vector<128xf32>
    %31 = vector.shape_cast %30 : vector<128xf32> to vector<1x128xf32>
    %c0_31 = arith.constant 0 : index
    %c0_32 = arith.constant 0 : index
    %32 = vector.load %arg4[%c0_31, %c0_32] : memref<128x10xf32, #tpu.memory_space<vmem>>, vector<128x10xf32>
    %cst_33 = arith.constant dense<0.000000e+00> : vector<1x10xf32>
    %33 = tpu.matmul %31, %32, %cst_33 {dimension_numbers = #tpu.dot_dimension_numbers<[1], [0], [0], [1], [0, 0, 1, 1], [], []>} : vector<1x128xf32>, vector<128x10xf32>, vector<1x10xf32> -> vector<1x10xf32>
    %c0_34 = arith.constant 0 : index
    %c0_35 = arith.constant 0 : index
    %34 = vector.load %arg5[%c0_34, %c0_35] : memref<1x10xf32, #tpu.memory_space<vmem>>, vector<1x10xf32>
    %35 = arith.addf %33, %34 : vector<1x10xf32>
    %c0_36 = arith.constant 0 : index
    %c0_37 = arith.constant 0 : index
    %c0_38 = arith.constant 0 : index
    %36 = vector.load %arg7[%c0_36, %c0_37, %c0_38] : memref<1x1x10xf32, #tpu.memory_space<vmem>>, vector<1x1x10xf32>
    %37 = vector.shape_cast %36 : vector<1x1x10xf32> to vector<1x10xf32>
    %38 = vector.shape_cast %35 : vector<1x10xf32> to vector<1x1x10xf32>
    tpu.vector_store %arg7[%c0_36, %c0_37, %c0_38], %38 {strides = array<i32>} : memref<1x1x10xf32, #tpu.memory_space<vmem>>, vector<1x1x10xf32>,
    return
  }
  func.func @transform_0(%arg0: i32) -> (i32, i32, i32) {
    %c0_i32 = arith.constant 0 : i32
    %c0_i32_0 = arith.constant 0 : i32
    %c0_i32_1 = arith.constant 0 : i32
    return %arg0, %c0_i32, %c0_i32_0 : i32, i32, i32
  }
  func.func @transform_1(%arg0: i32) -> (i32, i32, i32) {
    %c0_i32 = arith.constant 0 : i32
    %c0_i32_0 = arith.constant 0 : i32
    %c0_i32_1 = arith.constant 0 : i32
    %c0_i32_2 = arith.constant 0 : i32
    return %c0_i32, %c0_i32_0, %c0_i32_1 : i32, i32, i32
  }
  func.func @transform_2(%arg0: i32) -> (i32, i32) {
    %c0_i32 = arith.constant 0 : i32
    %c0_i32_0 = arith.constant 0 : i32
    %c0_i32_1 = arith.constant 0 : i32
    return %c0_i32, %c0_i32_0 : i32, i32
  }
  func.func @transform_3(%arg0: i32) -> (i32, i32) {
    %c0_i32 = arith.constant 0 : i32
    %c0_i32_0 = arith.constant 0 : i32
    %c0_i32_1 = arith.constant 0 : i32
    return %c0_i32, %c0_i32_0 : i32, i32
  }
  func.func @transform_4(%arg0: i32) -> (i32, i32) {
    %c0_i32 = arith.constant 0 : i32
    %c0_i32_0 = arith.constant 0 : i32
    %c0_i32_1 = arith.constant 0 : i32
    return %c0_i32, %c0_i32_0 : i32, i32
  }
  func.func @transform_5(%arg0: i32) -> (i32, i32, i32) {
    %c0_i32 = arith.constant 0 : i32
    %c0_i32_0 = arith.constant 0 : i32
    %c0_i32_1 = arith.constant 0 : i32
    return %arg0, %c0_i32, %c0_i32_0 : i32, i32, i32
  }
  func.func @transform_6(%arg0: i32) -> (i32, i32, i32) {
    %c0_i32 = arith.constant 0 : i32
    %c0_i32_0 = arith.constant 0 : i32
    %c0_i32_1 = arith.constant 0 : i32
    return %arg0, %c0_i32, %c0_i32_0 : i32, i32, i32
  }
}

</mosaic_0001>

<bundles_post_ra>
// kernel: tile.13
= control target key start
LH: loop header
LB: loop body
LE: loop exit
PB: predicated region body
PF: predicated region fallthrough
CT: control target
= control target key end

     0   :  { %s28_s0 = inlined_call_operand.vmem [shape: f32[8], index: 0, kind: input, shape index: {}]   ;;  %s29_s1 = inlined_call_operand.vmem [shape: f32[16,8], index: 1, kind: output, shape index: {}]  }
   0x1   :  { %v4_v0 = vld [vmem:[%s28_s0] ss:$0 sm:$0xff] }
   0x2   :  { %5 = vst [vmem:[%s29_s1] sm:$0xff] %v4_v0  ;;  %8 = vst [vmem:[%s29_s1 + $0x8] sm:$0xff] %v4_v0 }

// kernel: tile.14
= control target key start
LH: loop header
LB: loop body
LE: loop exit
PB: predicated region body
PF: predicated region fallthrough
CT: control target
= control target key end

     0   :  { %s131_s10 = smov 120   ;;  %s132_s11 = smov 104   ;;  %vm3_vm0 = vcmask 64512   ;;  %vm9_vm1 = vcmask 1048512   ;;  %vm15_vm2 = vcmask 982912   ;;  %vm21_vm3 = vcmask 917312   ;;  %s207_s0 = inlined_call_operand.vmem [shape: f32[16,8], index: 0, kind: input, shape index: {}]   ;;  %s208_s1 = inlined_call_operand.vmem [shape: f32[1,128], index: 1, kind: output, shape index: {}]  }
   0x1   :  { %v101_v0 = vld [vmem:[%s207_s0 + $0xf] sm:$0x1]   ;;  %v103_v1 = vld [vmem:[%s207_s0 + $0xd] sm:$0x1]   ;;  %v102_v2 = vld [vmem:[%s207_s0 + $0xe] sm:$0x1]  }
   0x2   :  { %7 = vrot.lane.b32.xlu0 %v101_v0, %s131_s10  ;;  %19 = vrot.lane.b32.xlu1 %v103_v1, %s132_s11  ;;  %v104_v3 = vld [vmem:[%s207_s0 + $0xc] sm:$0x1]   ;;  %s133_s16 = smov 112   ;;  %s134_s17 = smov 96   ;;  %v105_v4 = vld [vmem:[%s207_s0 + $0xb] sm:$0x1]  }
   0x3   :  { %v106_v5 = vld [vmem:[%s207_s0 + $0xa] sm:$0x1]   ;;  %v2_v6 = vld [vmem:[%s207_s0] sm:$0x1]   ;;  %s135_s24 = smov 88   ;;  %s136_s25 = smov 80  }
   0x4   :  { %4 = vst.msk [vmem:[#allocation0] sm:$0x1] %vm3_vm0, %v2_v6   ;;  %v107_v7 = vld [vmem:[%s207_s0 + $0x9] sm:$0x1]   ;;  %v108_v8 = vld [vmem:[%s207_s0 + $0x8] sm:$0x1]  }
   0x5   :  { %s137_s30 = smov 72   ;;  %s138_s2 = smov 64   ;;  %v109_v9 = vld [vmem:[%s207_s0 + $0x7] sm:$0x1]   ;;  %v110_v10 = vld [vmem:[%s207_s0 + $0x6] sm:$0x1]  }
   0x6   :  { %13 = vrot.lane.b32.xlu0 %v102_v2, %s133_s16  ;;  %25 = vrot.lane.b32.xlu1 %v104_v3, %s134_s17  ;;  %s139_s7 = smov 56   ;;  %s140_s8 = smov 48   ;;  %v111_v11 = vld [vmem:[%s207_s0 + $0x5] sm:$0x1]   ;;  %v112_v12 = vld [vmem:[%s207_s0 + $0x4] sm:$0x1]  }
   0x7   :  { %s141_s13 = smov 40   ;;  %s142_s14 = smov 32   ;;  %v113_v13 = vld [vmem:[%s207_s0 + $0x3] sm:$0x1]   ;;  %v114_v14 = vld [vmem:[%s207_s0 + $0x2] sm:$0x1]  }
   0x8   :  { %s143_s19 = smov 24   ;;  %s144_s20 = smov 16   ;;  %v115_v15 = vld [vmem:[%s207_s0 + $0x1] sm:$0x1]   ;;  %vm27_vm4 = vcmask 851712   ;;  %vm33_vm5 = vcmask 786112  }
   0x9   :  { %s145_s0 = smov 8   ;;  %vm39_vm6 = vcmask 720512   ;;  %vm45_vm7 = vcmask 654912   ;;  %vm51_vm8 = vcmask 589312   ;;  %vm57_vm9 = vcmask 523712  }
   0xa   :  { %31 = vrot.lane.b32.xlu0 %v105_v4, %s135_s24  ;;  %37 = vrot.lane.b32.xlu1 %v106_v5, %s136_s25  ;;  %vm63_vm10 = vcmask 458112   ;;  %vm69_vm11 = vcmask 392512   ;;  %vm75_vm12 = vcmask 326912   ;;  %vm81_vm13 = vcmask 261312  }
   0xb   :  { %vm87_vm14 = vcmask 195712   ;;  %vm93_vm15 = vcmask 130112  }
   0xe   :  { %43 = vrot.lane.b32.xlu0 %v107_v7, %s137_s30  ;;  %49 = vrot.lane.b32.xlu1 %v108_v8, %s138_s2 }
  0x12   :  { %55 = vrot.lane.b32.xlu0 %v109_v9, %s139_s7  ;;  %61 = vrot.lane.b32.xlu1 %v110_v10, %s140_s8 }
  0x16   :  { %67 = vrot.lane.b32.xlu0 %v111_v11, %s141_s13  ;;  %73 = vrot.lane.b32.xlu1 %v112_v12, %s142_s14 }
  0x1a   :  { %79 = vrot.lane.b32.xlu0 %v113_v13, %s143_s19  ;;  %85 = vrot.lane.b32.xlu1 %v114_v14, %s144_s20 }
  0x1e   :  { %91 = vrot.lane.b32.xlu0 %v115_v15, %s145_s0 }
  0x74   :  { %v8_v16 = vpop.permute.xlu0 %7   ;;  %v20_v17 = vpop.permute.xlu1 %19  }
  0x75   :  { %10 = vst.msk [vmem:[#allocation0] sm:$0x1] %vm9_vm1, %v8_v16  }
  0x78   :  { %v14_v18 = vpop.permute.xlu0 %13   ;;  %v26_v19 = vpop.permute.xlu1 %25  }
  0x79   :  { %16 = vst.msk [vmem:[#allocation0] sm:$0x1] %vm15_vm2, %v14_v18  }
  0x7a   :  { %22 = vst.msk [vmem:[#allocation0] sm:$0x1] %vm21_vm3, %v20_v17  }
  0x7b   :  { %28 = vst.msk [vmem:[#allocation0] sm:$0x1] %vm27_vm4, %v26_v19  }
  0x7c   :  { %v32_v20 = vpop.permute.xlu0 %31   ;;  %v38_v21 = vpop.permute.xlu1 %37  }
  0x7d   :  { %34 = vst.msk [vmem:[#allocation0] sm:$0x1] %vm33_vm5, %v32_v20  }
  0x7e   :  { %40 = vst.msk [vmem:[#allocation0] sm:$0x1] %vm39_vm6, %v38_v21  }
  0x80   :  { %v44_v22 = vpop.permute.xlu0 %43   ;;  %v50_v23 = vpop.permute.xlu1 %49  }
  0x81   :  { %46 = vst.msk [vmem:[#allocation0] sm:$0x1] %vm45_vm7, %v44_v22  }
  0x82   :  { %52 = vst.msk [vmem:[#allocation0] sm:$0x1] %vm51_vm8, %v50_v23  }
  0x84   :  { %v56_v24 = vpop.permute.xlu0 %55   ;;  %v62_v25 = vpop.permute.xlu1 %61  }
  0x85   :  { %58 = vst.msk [vmem:[#allocation0] sm:$0x1] %vm57_vm9, %v56_v24  }
  0x86   :  { %64 = vst.msk [vmem:[#allocation0] sm:$0x1] %vm63_vm10, %v62_v25  }
  0x88   :  { %v68_v26 = vpop.permute.xlu0 %67   ;;  %v74_v27 = vpop.permute.xlu1 %73  }
  0x89   :  { %70 = vst.msk [vmem:[#allocation0] sm:$0x1] %vm69_vm11, %v68_v26  }
  0x8a   :  { %76 = vst.msk [vmem:[#allocation0] sm:$0x1] %vm75_vm12, %v74_v27  }
  0x8c   :  { %v80_v28 = vpop.permute.xlu0 %79   ;;  %v86_v29 = vpop.permute.xlu1 %85  }
  0x8d   :  { %82 = vst.msk [vmem:[#allocation0] sm:$0x1] %vm81_vm13, %v80_v28  }
  0x8e   :  { %88 = vst.msk [vmem:[#allocation0] sm:$0x1] %vm87_vm14, %v86_v29  }
  0x90   :  { %v92_v30 = vpop.permute.xlu0 %91  }
  0x91   :  { %94 = vst.msk [vmem:[#allocation0] sm:$0x1] %vm93_vm15, %v92_v30  }
  0x98   :  { %v98_v31 = vld [vmem:[#allocation0] sm:$0x1] }
  0x99   :  { %100 = vst [vmem:[%s208_s1] sm:$0x1] %v98_v31 }

// kernel: concat_models_forward.1
= control target key start
LH: loop header
LB: loop body
LE: loop exit
PB: predicated region body
PF: predicated region fallthrough
CT: control target
= control target key end

     0   :  { %12 = vsyncpa [#allocation4], 0  ;;  %s1408_s0 = inlined_call_operand.vmem [shape: f32[2,16,64], index: 0, kind: input, shape index: {}]   ;;  %s1409_s1 = inlined_call_operand.vmem [shape: f32[3,64,128], index: 1, kind: input, shape index: {}]   ;;  %s1410_s2 = inlined_call_operand.vmem [shape: f32[1,128], index: 2, kind: input, shape index: {}]   ;;  %s1411_s3 = inlined_call_operand.vmem [shape: f32[128,10], index: 3, kind: input, shape index: {}]   ;;  %s1412_s4 = inlined_call_operand.vmem [shape: f32[1,10], index: 4, kind: input, shape index: {}]   ;;  %s1413_s5 = inlined_call_operand.vmem [shape: f32[2,16,128], index: 5, kind: output, shape index: {0}]   ;;  %s1414_s6 = inlined_call_operand.hbm [shape: f32[2,1,10], index: 6, kind: output, shape index: {1}]  }
   0x1   :  { %14 = vsyncpa [#allocation4 + $0x1], 0  ;;  %s1153_s21 = smov 0   ;;  %s1155_s22 = smov 0  }
   0x2   :  { %s1157_s23 = smov 0   ;;  %s1159_s24 = smov 0  }
   0x3 LB: > { %s1174_s25 = sadd.s32 4294967295, %s1112_s24   ;;  %s757_s26 = sadd.s32 4294967294, %s1112_s24   ;;  %s1112_s24 = sphi %s1159_s24, %s1420_s24   ;;  %s1108_s23 = sphi %s1157_s23, %s1419_s23   ;;  %s1104_s22 = sphi %s1155_s22, %s1418_s22   ;;  %s1100_s21 = sphi %s1153_s21, %s1417_s21  }
   0x4   : > { %s1178_s27 = sadd.s32 1, %s1112_s24   ;;  %s163_s28 = sadd.s32 1, %s1108_s23 }
   0x5   : > { %s160_s29 = ssub.s32 %s1112_s24, %s1178_s27  ;;  %p173_p0 = scmp.ne.s32.totalorder %s1108_s23, %s1104_s22 }
   0x6   : > { %p161_p1 = scmp.eq.s32.totalorder %s160_s29, 0  ;;  %p174_p2 = scmp.eq.s32.totalorder %s1174_s25, 1 }
   0x7   : > { %p179_p3 = scmp.ne.s32.totalorder %s1104_s22, %s1100_s21  ;;  %p180_p4 = scmp.eq.s32.totalorder %s757_s26, 1 }
   0x8   : > { %s1189_s30 = scalar_select %p161_p1, %s1108_s23, %s163_s28  }
   0x9   : > { %p1191_p5 = por %p174_p2, %p173_p0  ;;  %p1195_p6 = por %p180_p4, %p179_p3 }
   0xa   : > { %p760_p7 = scmp.ge.s32.totalorder %s1112_s24, 1  ;;  %p218_p8 = scmp.lt.s32.totalorder %s1112_s24, 3 }
   0xc   : > { %p219_p9 = pnand %p760_p7, %p218_p8 }
   0xd   : > { %v765_v0 = vld [vmem:[%s1409_s1 + $0x40] sm:$0xff] (!%p219_p9)  ;;  %v766_v1 = vld [vmem:[%s1409_s1 + $0x48] sm:$0xff] (!%p219_p9)  ;;  %v767_v2 = vld [vmem:[%s1409_s1 + $0x50] sm:$0xff] (!%p219_p9)  ;;  %p252_p10 = scmp.lt.s32.totalorder (!%p219_p9), %s1174_s25, 1  ;;  %vm262_vm0 = vcmask (!%p219_p9), 516096   ;;  %v1114_v8 = vmov (!%p219_p9), 0.0  }
   0xe   : > { %222 = sbr.rel (%p219_p9) target bundleno = 526 (0x20e), region = 40  ;;  %v932_v3 = vpack.c.bf16 (!%p219_p9), %v766_v1, %v765_v0  ;;  %v768_v4 = vld [vmem:[%s1409_s1 + $0x58] sm:$0xff] (!%p219_p9)  ;;  %v769_v6 = vld [vmem:[%s1409_s1 + $0x60] sm:$0xff] (!%p219_p9)  ;;  %v770_v7 = vld [vmem:[%s1409_s1 + $0x68] sm:$0xff] (!%p219_p9)  ;;  %263 = vst.msk [vmem:[#allocation2] sm:$0x1] (!%p219_p9), %vm262_vm0, %v1114_v8 }
   0xf   : > { %v936_v5 = vpack.c.bf16 (!%p219_p9), %v768_v4, %v767_v2  ;;  %264 = vst.msk [vmem:[#allocation2 + $0x11] sm:$0x1] (!%p219_p9), %vm262_vm0, %v1114_v8  ;;  %v1115_v9 = vmov (!%p219_p9), 0.0|0.0   ;;  %vm267_vm1 = vcmask (!%p219_p9), 523264   ;;  %v940_v10 = vpack.c.bf16 (!%p219_p9), %v770_v7, %v769_v6  ;;  %v771_v11 = vld [vmem:[%s1409_s1 + $0x70] sm:$0xff] (!%p219_p9)  ;;  %v772_v12 = vld [vmem:[%s1409_s1 + $0x78] sm:$0xff] (!%p219_p9) }
  0x10   : > { %980 = vmatprep.subr.bf16.mxu1 (!%p219_p9), %v1115_v9  ;;  %933 = vmatprep.subr.bf16.mxu0 (!%p219_p9), %v932_v3  ;;  %v567_v15 = vld [vmem:[%s1411_s3] sm:$0xff] (!%p219_p9)  ;;  %v944_v16 = vpack.c.bf16 (!%p219_p9), %v772_v12, %v771_v11  ;;  %v568_v17 = vld [vmem:[%s1411_s3 + $0x8] sm:$0xff] (!%p219_p9)  ;;  %v569_v18 = vld [vmem:[%s1411_s3 + $0x10] sm:$0xff] (!%p219_p9)  ;;  %vm1116_vm2 = vmmov (!%p219_p9), 0   ;;  %vm654_vm3 = vcmask (!%p219_p9), 73728  }
  0x11   : > { %935 = vmatpush3.bf16.msra.mxu0 (!%p219_p9), %v932_v3  ;;  %v570_v19 = vld [vmem:[%s1411_s3 + $0x18] sm:$0xff] (!%p219_p9)  ;;  %v272_v20 = vld [vmem:[%s1409_s1] sm:$0xff] (!%p219_p9)  ;;  %v273_v21 = vld [vmem:[%s1409_s1 + $0x8] sm:$0xff] (!%p219_p9)  ;;  %v981_v22 = vpack.c.bf16 (!%p219_p9), %v568_v17, %v567_v15  ;;  %929 = vmatprep.mubr.msk.f32.mxu1 (!%p219_p9), %vm1116_vm2, %v1114_v8 }
  0x12   : > { %937 = vmatprep.subr.bf16.mxu0 (!%p219_p9), %v936_v5  ;;  %v984_v23 = vpack.c.bf16 (!%p219_p9), %v570_v19, %v569_v18  ;;  %v948_v24 = vpack.c.bf16 (!%p219_p9), %v273_v21, %v272_v20  ;;  %v274_v25 = vld [vmem:[%s1409_s1 + $0x10] sm:$0xff] (!%p219_p9)  ;;  %v275_v26 = vld [vmem:[%s1409_s1 + $0x18] sm:$0xff] (!%p219_p9)  ;;  %v571_v28 = vld [vmem:[%s1411_s3 + $0x20] sm:$0xff] (!%p219_p9) }
  0x13   : > { %982 = vmatpush3.bf16.msra.mxu1 (!%p219_p9), %v981_v22  ;;  %v572_v29 = vld [vmem:[%s1411_s3 + $0x28] sm:$0xff] (!%p219_p9)  ;;  %v952_v31 = vpack.c.bf16 (!%p219_p9), %v275_v26, %v274_v25  ;;  %v276_v34 = vld [vmem:[%s1409_s1 + $0x20] sm:$0xff] (!%p219_p9)  ;;  %v278_v37 = vld [vmem:[%s1409_s1 + $0x30] sm:$0xff] (!%p219_p9) }
  0x14   : > { %983 = vmatprep.subr.bf16.mxu1 (!%p219_p9), %v1115_v9  ;;  %v987_v33 = vpack.c.bf16 (!%p219_p9), %v572_v29, %v571_v28  ;;  %v277_v35 = vld [vmem:[%s1409_s1 + $0x28] sm:$0xff] (!%p219_p9)  ;;  %v279_v38 = vld [vmem:[%s1409_s1 + $0x38] sm:$0xff] (!%p219_p9)  ;;  %v777_v40 = vld [vmem:[%s1409_s1 + $0x80] sm:$0xff] (!%p219_p9) }
  0x15   : > { %s1221_s26 = scalar_select %p252_p10, %s1174_s25, 1  ;;  %939 = vmatpush3.bf16.msra.mxu0 %v936_v5  ;;  %v956_v36 = vpack.c.bf16 %v277_v35, %v276_v34  ;;  %v960_v39 = vpack.c.bf16 %v279_v38, %v278_v37  ;;  %v778_v41 = vld [vmem:[%s1409_s1 + $0x88] sm:$0xff]  ;;  %v779_v43 = vld [vmem:[%s1409_s1 + $0x90] sm:$0xff]  ;;  %v780_v44 = vld [vmem:[%s1409_s1 + $0x98] sm:$0xff] }
  0x16   : > { %941 = vmatprep.subr.bf16.mxu0 %v940_v10  ;;  %v964_v42 = vpack.c.bf16 %v778_v41, %v777_v40  ;;  %v968_v46 = vpack.c.bf16 %v780_v44, %v779_v43  ;;  %v781_v48 = vld [vmem:[%s1409_s1 + $0xa0] sm:$0xff]  ;;  %v782_v49 = vld [vmem:[%s1409_s1 + $0xa8] sm:$0xff]  ;;  %v783_v51 = vld [vmem:[%s1409_s1 + $0xb0] sm:$0xff] }
  0x17   : > { %s791_s28 = sshll.u32 %s1221_s26, 4  ;;  %985 = vmatpush3.bf16.msra.mxu1 %v984_v23  ;;  %v972_v50 = vpack.c.bf16 %v782_v49, %v781_v48  ;;  %v784_v52 = vld [vmem:[%s1409_s1 + $0xb8] sm:$0xff]  ;;  %v573_v55 = vld [vmem:[%s1411_s3 + $0x30] sm:$0xff]  ;;  %v575_v58 = vld [vmem:[%s1411_s3 + $0x40] sm:$0xff]  ;;  %s250_s26 = sand.u32 1, %s1104_s22  }
  0x18   : > { %s256_s12 = scalar_lea.vmem %s1408_s0, %s791_s28  ;;  %986 = vmatprep.subr.bf16.mxu1 %v1115_v9  ;;  %v976_v53 = vpack.c.bf16 %v784_v52, %v783_v51  ;;  %v574_v56 = vld [vmem:[%s1411_s3 + $0x38] sm:$0xff]  ;;  %v576_v59 = vld [vmem:[%s1411_s3 + $0x48] sm:$0xff]  ;;  %v577_v61 = vld [vmem:[%s1411_s3 + $0x50] sm:$0xff]  ;;  %s261_s18 = scalar_lea.vmem %s1413_s5, %s791_s28 }
  0x19   : > { %v265_v13 = vld [vmem:[%s256_s12] sm:$0xff]  ;;  %v266_v14 = vld [vmem:[%s256_s12 + $0x8] sm:$0xff]  ;;  %943 = vmatpush3.bf16.msra.mxu0 %v940_v10  ;;  %v990_v57 = vpack.c.bf16 %v574_v56, %v573_v55  ;;  %v993_v60 = vpack.c.bf16 %v576_v59, %v575_v58  ;;  %v578_v62 = vld [vmem:[%s1411_s3 + $0x58] sm:$0xff]  ;;  %s788_s28 = sshll.u32 %s1174_s25, 4  ;;  %s251_s29 = scalar_lea.vmem [#allocation3], %s250_s26 }
  0x1a   : > { %268 = vst.msk [vmem:[#allocation2 + $0x1] sm:$0xff] %vm267_vm1, %v265_v13  ;;  %269 = vst.msk [vmem:[#allocation2 + $0x9] sm:$0xff] %vm267_vm1, %v266_v14  ;;  %945 = vmatprep.subr.bf16.mxu0 %v944_v16  ;;  %v996_v63 = vpack.c.bf16 %v578_v62, %v577_v61  ;;  %v579_v0 = vld [vmem:[%s1411_s3 + $0x60] sm:$0xff]  ;;  %v580_v1 = vld [vmem:[%s1411_s3 + $0x68] sm:$0xff]  ;;  %s677_s9 = sshll.u32 %s251_s29, 4  ;;  %s1366_s12 = scalar_lea.hbm %s1414_s6, %s788_s28  ;;  %s1368_s9 = int_to_ptr.vmem [resolvable:$true] %s677_s9 }
  0x1b   : > { %988 = vmatpush3.bf16.msra.mxu1 %v987_v33  ;;  %v999_v2 = vpack.c.bf16 %v580_v1, %v579_v0  ;;  %v581_v3 = vld [vmem:[%s1411_s3 + $0x70] sm:$0xff]  ;;  %v582_v4 = vld [vmem:[%s1411_s3 + $0x78] sm:$0xff]  ;;  %v787_v6 = vld [vmem:[%s1410_s2] ss:$0 sm:$0xff]  ;;  %s662_s13 = scalar_lea.sflag [#allocation4], %s250_s26  ;;  %s1050_s14 = scalar_lea.vmem %s1368_s9, 16 }
  0x1c   : > { %989 = vmatprep.subr.bf16.mxu1 %v1115_v9  ;;  %v1002_v5 = vpack.c.bf16 %v582_v4, %v581_v3  ;;  %v583_v20 = vld [vmem:[%s1412_s4] sm:$0x1]  ;;  %p1051_p11 = scmp.ne.s32.totalorder %s1368_s9, %s1050_s14  ;;  %s1117_s25 = smov [#allocation3]  }
  0x1d   : > { %947 = vmatpush3.bf16.msra.mxu0 %v944_v16  ;;  %s1054_s15 = sshll.u32 %s1117_s25, 4  ;;  %s1055_s15 = int_to_ptr.vmem [resolvable:$false] %s1054_s15 }
  0x1e   : > { %949 = vmatprep.subr.bf16.mxu0 %v948_v24  ;;  %p1052_p12 = pnand %p1051_p11, %p1191_p5  ;;  %s1056_s16 = scalar_lea.vmem %s1055_s15, 32 }
  0x1f   : > { %991 = vmatpush3.bf16.msra.mxu1 %v990_v57  ;;  %p1057_p0 = scmp.lt.s32.totalorder %s1368_s9, %s1055_s15  ;;  %p1058_p1 = scmp.lt.s32.totalorder %s1056_s16, %s1050_s14 }
  0x20   : > { %992 = vmatprep.subr.bf16.mxu1 %v1115_v9  ;;  %p1053_p13 = pneg %p1052_p12 }
  0x21   : > { %v280_v27 = vld [vmem:[#allocation2 + $0x1] sm:$0xff]  ;;  %v281_v30 = vld [vmem:[#allocation2 + $0x9] sm:$0xff]  ;;  %p1059_p2 = por %p1058_p1, %p1057_p0 }
  0x22   : > { %856 = vmatprep.mubr.msk.f32.mxu0 %vm267_vm1, %v280_v27  ;;  %v270_v32 = vld [vmem:[#allocation2] sm:$0xff]  ;;  %v271_v45 = vld [vmem:[#allocation2 + $0x8] sm:$0xff] }
  0x23   : > { %857 = vmatmul.mubr.msk.f32.vlgmr.msra.gmra.mrb[0].mxu0 %vm267_vm1, %v281_v30  ;;  %v453_v47 = vld [vmem:[#allocation2 + $0x2] sm:$0xff]  ;;  %v454_v54 = vld [vmem:[#allocation2 + $0xa] sm:$0xff]  ;;  %994 = vmatpush3.bf16.msra.mxu1 %v993_v60  ;;  %p1060_p3 = pnand %p1059_p2, %p1053_p13 }
  0x24   : > { %951 = vmatpush3.bf16.msra.mxu0 %v948_v24  ;;  %875 = vmatprep.mubr.msk.f32.mxu0 %vm267_vm1, %v270_v32 }
  0x25   : > { %953 = vmatprep.subr.bf16.mxu0 %v952_v31  ;;  %995 = vmatprep.subr.bf16.mxu1 %v1115_v9 }
  0x27   : > { %997 = vmatpush3.bf16.msra.mxu1 %v996_v63 }
  0x28   : > { %955 = vmatpush3.bf16.msra.mxu0 %v952_v31  ;;  %998 = vmatprep.subr.bf16.mxu1 %v1115_v9 }
  0x29   : > { %957 = vmatprep.subr.bf16.mxu0 %v956_v36 }
  0x2b   : > { %1000 = vmatpush3.bf16.msra.mxu1 %v999_v2 }
  0x2c   : > { %959 = vmatpush3.bf16.msra.mxu0 %v956_v36  ;;  %1001 = vmatprep.subr.bf16.mxu1 %v1115_v9 }
  0x2d   : > { %961 = vmatprep.subr.bf16.mxu0 %v960_v39 }
  0x2f   : > { %1003 = vmatpush3.bf16.msra.mxu1 %v1002_v5 }
  0x30   : > { %963 = vmatpush3.bf16.msra.mxu0 %v960_v39 }
  0x31   : > { %965 = vmatprep.subr.bf16.mxu0 %v964_v42 }
  0x33   : > { %876 = vmatmul.mubr.msk.f32.vlgmr.msra.gmra.mrb[0].mxu0 %vm267_vm1, %v271_v45 }
  0x34   : > { %967 = vmatpush3.bf16.msra.mxu0 %v964_v42  ;;  %894 = vmatprep.mubr.msk.f32.mxu0 %vm267_vm1, %v453_v47 }
  0x35   : > { %969 = vmatprep.subr.bf16.mxu0 %v968_v46 }
  0x38   : > { %971 = vmatpush3.bf16.msra.mxu0 %v968_v46 }
  0x39   : > { %973 = vmatprep.subr.bf16.mxu0 %v972_v50 }
  0x3c   : > { %975 = vmatpush3.bf16.msra.mxu0 %v972_v50 }
  0x3d   : > { %977 = vmatprep.subr.bf16.mxu0 %v976_v53 }
  0x40   : > { %979 = vmatpush3.bf16.msra.mxu0 %v976_v53 }
  0x43   : > { %895 = vmatmul.mubr.msk.f32.vlgmr.msra.gmra.mrb[0].mxu0 %vm267_vm1, %v454_v54 }
 0x116   : > { %v896_v7 = vpop.f32.mrb[0].mxu0 }
 0x117   : > { %v555_v10 = vadd.f32 %v896_v7, %v787_v6  ;;  %v536_v11 = vpop.f32.mrb[1].mxu0 }
 0x118   : > { %v554_v12 = vadd.f32 %v787_v6, %v536_v11 }
 0x119   : > { %v557_v13 = vmax.f32 %v555_v10, 0.0 }
 0x11a   : > { %v556_v8 = vmax.f32 %v554_v12, 0.0 }
 0x11b   : > { %559 = vst [vmem:[%s261_s18 + $0x8] sm:$0xff] %v557_v13 }
 0x11c   : > { %558 = vst [vmem:[%s261_s18] sm:$0xff] %v556_v8  ;;  %v560_v9 = vadd.f32 %v557_v13, %v556_v8 }
 0x11e   : > { %v561_v14 = vrot.slane %v560_v9, 4 }
 0x120   : > { %v562_v15 = vadd.f32 %v561_v14, %v560_v9 }
 0x122   : > { %v563_v16 = vrot.slane %v562_v15, 2 }
 0x124   : > { %v564_v17 = vadd.f32 %v563_v16, %v562_v15 }
 0x126   : > { %v565_v18 = vrot.slane %v564_v17, 1 }
 0x128   : > { %v566_v19 = vadd.f32 %v565_v18, %v564_v17 }
 0x12a   : > { %930 = vmatmul.mubr.f32.vlgmr.msra.gmra.mrb[0].mxu1 %v566_v19 }
 0x1fd   : > { %v650_v21 = vpop.f32.mrb[0].mxu1 }
 0x1fe   : > { %v651_v22 = vadd.f32 %v650_v21, %v583_v20  ;;  %v931_v23 = vpop.f32.mrb[1].mxu1 }
 0x200   : > { %655 = vst.msk [vmem:[%s251_s29] sm:$0x1] %vm654_vm3, %v651_v22 }
 0x201   : > { %1063 = shalt.err (!%p1060_p3)
}
 0x202   : > { %s1064_s17 = scalar_lea.hbm %s1366_s12, 16  ;;  %s1068_s19 = scalar_lea.hbm %s1414_s6, 32 }
 0x203   : > { %p1065_p4 = scmp.ne.s32.totalorder %s1366_s12, %s1064_s17  ;;  %p1069_p9 = scmp.lt.u32.totalorder %s1366_s12, %s1414_s6 }
 0x204   : > { %p1070_p10 = scmp.lt.u32.totalorder %s1068_s19, %s1064_s17  ;;  %p1072_p12 = scmp.lt.u32.totalorder %s1064_s17, %s1366_s12 }
 0x205   : > { %p1066_p7 = pnand %p1065_p4, %p1191_p5 }
 0x206   : > { %p1071_p11 = por %p1070_p10, %p1069_p9 }
 0x207   : > { %p1067_p8 = pneg %p1066_p7 }
 0x208   : > { %p1073_p13 = por %p1072_p12, %p1071_p11 }
 0x20a   : > { %p1074_p0 = pnand %p1073_p13, %p1067_p8 }
 0x20c   : > { %1077 = shalt.err (!%p1074_p0)
}
 0x20d   : > { %1008 = dma.vmem_to_hbm [thread:$0]  (%p1191_p5), %s1368_s9, 16, %s1366_s12, %s662_s13  }
 0x20e PF: > { %p1014_p1 = scmp.ge.s32.totalorder %s1112_s24, 2  ;;  %s697_s29 = sand.u32 1, %s1100_s21  }
 0x20f   : > { %s698_s10 = scalar_lea.sflag [#allocation4], %s697_s29 }
 0x210   : > { %p1011_p2 = pnand %p1014_p1, %p1195_p6 }
 0x212   : > { %1095 = dma.done.wait (!%p1011_p2), %s698_s10, 16  }
 0x213   : > { %1097 = vsyncadd (!%p1011_p2), %s698_s10, 4294967280  ;;  %p17_p3 = scmp.ge.s32.totalorder %s1178_s27, 4   ;;  %s1417_s21 = smov %s1104_s22 }
 0x214   : > { %s1418_s22 = smov %s1108_s23  ;;  %s1419_s23 = smov %s1189_s30 }
 0x215   : > { %s1420_s24 = smov %s1178_s27  ;;  %19 = sbr.rel (!%p17_p3) target bundleno = 3 (0x3), region = 89 }
 0x21c   :  { %702 = vsyncpa [#allocation4], 1 }
 0x21d   :  { %704 = vsyncpa [#allocation4 + $0x1], 1 }

</bundles_post_ra>
